<compile_context>
chip_gen: v6e
topology: v6e:2x2x1
jax: 0.10.0
libtpu: 0.0.40
codegen_flags: <defaults>
</compile_context>

<pallas_src>
import jax
import jax.numpy as jnp
from jax.experimental import pallas as pl
from jax.experimental.pallas import tpu as pltpu

IN_FEATURES = 28 * 28
HIDDEN = 50
OUT_FEATURES = 10
LANE = 128           # pad narrow feature dims (50, 10) up to lane width
MAX_TILE_B = 4096    # batch tile upper bound (multiple of 8)


def mlp_kernel(x_ref, w1_ref, b1_ref, w2_ref, b2_ref, w3_ref, b3_ref, o_ref):
    # x_ref: (tile_b, 784) bf16; w1: (784,128) bf16; w2,w3: (128,128) bf16;
    # biases: (1,128) f32; o_ref: (tile_b, 128) bf16.
    x = x_ref[...]
    h1 = jnp.tanh(
        jnp.dot(x, w1_ref[...], preferred_element_type=jnp.float32) + b1_ref[...]
    ).astype(jnp.bfloat16)
    h2 = jnp.tanh(
        jnp.dot(h1, w2_ref[...], preferred_element_type=jnp.float32) + b2_ref[...]
    ).astype(jnp.bfloat16)
    out = jnp.dot(h2, w3_ref[...], preferred_element_type=jnp.float32) + b3_ref[...]
    o_ref[...] = out.astype(o_ref.dtype)


def _pad2(a, rows, cols):
    return jnp.pad(a, ((0, rows - a.shape[0]), (0, cols - a.shape[1])))


def _round_up(n, m):
    return ((n + m - 1) // m) * m


def _vmem_cap_bytes():
    """Per-generation usable VMEM cap (~3/4 of physical), robust fallback."""
    try:
        info = pltpu.get_tpu_info()
        phys = getattr(info, "vmem_capacity_bytes", None)
        if phys:
            return int(phys) * 3 // 4
    except Exception:
        pass
    return 48 << 20  # conservative (v7x-sized) fallback


def prepare_params(params):
    """Pad the six weight/bias tensors once (lane-dense) and cast weights to bf16.

    Do this once outside the training/eval loop; the forward pass reuses them.
    """
    w1, b1, w2, b2, w3, b3 = params
    w1p = _pad2(w1, IN_FEATURES, LANE).astype(jnp.bfloat16)
    w2p = _pad2(w2, LANE, LANE).astype(jnp.bfloat16)
    w3p = _pad2(w3, LANE, LANE).astype(jnp.bfloat16)
    b1p = _pad2(b1, 1, LANE).astype(jnp.float32)
    b2p = _pad2(b2, 1, LANE).astype(jnp.float32)
    b3p = _pad2(b3, 1, LANE).astype(jnp.float32)
    return (w1p, b1p, w2p, b2p, w3p, b3p)


def simple_mlp_forward(x, prepared_params):
    """x: (B, 1, 28, 28) or (B, 784). Returns (B, 10) float32 logits."""
    w1p, b1p, w2p, b2p, w3p, b3p = prepared_params
    B = x.shape[0]
    x2d = x.reshape(B, -1).astype(jnp.bfloat16)  # same as x.view(x.size(0), -1)
    assert x2d.shape[1] == IN_FEATURES

    # Only pad the batch when it isn't a multiple of 8 (sublane requirement).
    # TODO(synk): for very large ragged B, split off the <8-row remainder
    # instead of copying x; common ML batch sizes make this a no-op.
    b8 = _round_up(B, 8)
    if b8 != B:
        x2d = jnp.pad(x2d, ((0, b8 - B), (0, 0)))

    # Tile choice: large tiles to amortize ~0.35us/step overhead, but keep
    # >=4 grid steps (when B allows) for pipelining and v7x 2-core sharding.
    tile_b = min(MAX_TILE_B, max(8, _round_up(pl.cdiv(b8, 4), 8)))
    grid = (pl.cdiv(b8, tile_b),)  # partial last block handled by Pallas

    x_spec = pl.BlockSpec((tile_b, IN_FEATURES), lambda i: (i, 0))
    out_spec = pl.BlockSpec((tile_b, LANE), lambda i: (i, 0))
    resident = lambda a: pl.BlockSpec(a.shape, lambda i: (0, 0))  # VMEM-resident

    # --- scheduling hints ---
    flops = 2 * B * (IN_FEATURES * HIDDEN + HIDDEN * HIDDEN + HIDDEN * OUT_FEATURES)
    weight_bytes = sum(
        int(a.size) * a.dtype.itemsize for a in prepared_params
    )
    cost = pl.CostEstimate(
        flops=flops,
        transcendentals=2 * HIDDEN * B,
        bytes_accessed=b8 * IN_FEATURES * 2 + b8 * LANE * 2 + weight_bytes,
    )

    vmem_needed = (
        2 * tile_b * IN_FEATURES * 2   # double-buffered bf16 x tiles
        + 2 * tile_b * LANE * 2        # double-buffered bf16 output tiles
        + 2 * weight_bytes             # resident weights (with buffers)
        + (4 << 20)                    # headroom
    )
    vmem_limit = int(min(max(vmem_needed, 16 << 20), _vmem_cap_bytes()))

    out_padded = pl.pallas_call(
        mlp_kernel,
        out_shape=jax.ShapeDtypeStruct((b8, LANE), jnp.bfloat16),
        grid=grid,
        in_specs=[x_spec, resident(w1p), resident(b1p), resident(w2p),
                  resident(b2p), resident(w3p), resident(b3p)],
        out_specs=out_spec,
        compiler_params=pltpu.CompilerParams(
            dimension_semantics=("parallel",),
            vmem_limit_bytes=vmem_limit,
        ),
        cost_estimate=cost,
    )(x2d, w1p, b1p, w2p, b2p, w3p, b3p)

    return out_padded[:B, :OUT_FEATURES].astype(jnp.float32)


def init_params(key):
    """Deterministic init matching nn.Linear shapes (stored pre-transposed)."""
    def linear(key, fan_in, fan_out):
        kw, kb = jax.random.split(key)
        bound = 1.0 / jnp.sqrt(fan_in)
        # PyTorch stores (out, in); we keep (in, out) so kernel does x @ W.
        w = jax.random.uniform(kw, (fan_in, fan_out), jnp.float32, -bound, bound)
        b = jax.random.uniform(kb, (1, fan_out), jnp.float32, -bound, bound)
        return w, b

    k1, k2, k3 = jax.random.split(key, 3)
    w1, b1 = linear(k1, IN_FEATURES, HIDDEN)
    w2, b2 = linear(k2, HIDDEN, HIDDEN)
    w3, b3 = linear(k3, HIDDEN, OUT_FEATURES)
    return (w1, b1, w2, b2, w3, b3)


def reference_forward(x, params):
    w1, b1, w2, b2, w3, b3 = params
    x2d = x.reshape(x.shape[0], -1)
    h1 = jnp.tanh(x2d @ w1 + b1)
    h2 = jnp.tanh(h1 @ w2 + b2)
    return h2 @ w3 + b3


if __name__ == "__main__":
    key = jax.random.PRNGKey(0)
    kx, kp = jax.random.split(key)

    B = 8
    x = jax.random.normal(kx, (B, 1, 28, 28), dtype=jnp.float32)  # NCHW MNIST-like
    params = init_params(kp)
    prepared = prepare_params(params)  # pad + bf16-cast once, reuse across calls

    out = simple_mlp_forward(x, prepared)
    out = jax.block_until_ready(out)

    ref = reference_forward(x, params)  # f32 reference
    assert out.shape == (B, 10)
    # bf16 inputs/weights => relaxed tolerance vs. the f32 reference.
    assert jnp.allclose(out, ref, atol=3e-2, rtol=3e-2), "mismatch vs reference"

    print("KERNEL_OK")
</pallas_src>

<mosaic_0001>
module attributes {stable_mosaic.version = 11 : i64} {
  func.func @mlp_kernel(%arg0: i32, %arg1: memref<8x784xbf16, #tpu.memory_space<vmem>>, %arg2: memref<784x128xbf16, #tpu.memory_space<vmem>>, %arg3: memref<1x128xf32, #tpu.memory_space<vmem>>, %arg4: memref<128x128xbf16, #tpu.memory_space<vmem>>, %arg5: memref<1x128xf32, #tpu.memory_space<vmem>>, %arg6: memref<128x128xbf16, #tpu.memory_space<vmem>>, %arg7: memref<1x128xf32, #tpu.memory_space<vmem>>, %arg8: memref<8x128xbf16, #tpu.memory_space<vmem>>) attributes {dimension_semantics = [#tpu.dimension_semantics<parallel>], iteration_bounds = array<i64: 1>, scalar_prefetch = 0 : i64, scratch_operands = 0 : i64, tpu.core_type = #tpu.core_type<tc>, window_params = [{transform_indices = @transform_0, window_bounds = array<i64: 8, 784>}, {pipeline_mode = #tpu.pipeline_mode<synchronous>, transform_indices = @transform_1, window_bounds = array<i64: 784, 128>}, {pipeline_mode = #tpu.pipeline_mode<synchronous>, transform_indices = @transform_2, window_bounds = array<i64: 1, 128>}, {pipeline_mode = #tpu.pipeline_mode<synchronous>, transform_indices = @transform_3, window_bounds = array<i64: 128, 128>}, {pipeline_mode = #tpu.pipeline_mode<synchronous>, transform_indices = @transform_4, window_bounds = array<i64: 1, 128>}, {pipeline_mode = #tpu.pipeline_mode<synchronous>, transform_indices = @transform_5, window_bounds = array<i64: 128, 128>}, {pipeline_mode = #tpu.pipeline_mode<synchronous>, transform_indices = @transform_6, window_bounds = array<i64: 1, 128>}, {transform_indices = @transform_7, window_bounds = array<i64: 8, 128>}]} {
    %c0 = arith.constant 0 : index
    %c0_0 = arith.constant 0 : index
    %0 = vector.load %arg1[%c0, %c0_0] : memref<8x784xbf16, #tpu.memory_space<vmem>>, vector<8x784xbf16>
    %c0_1 = arith.constant 0 : index
    %c0_2 = arith.constant 0 : index
    %1 = vector.load %arg2[%c0_1, %c0_2] : memref<784x128xbf16, #tpu.memory_space<vmem>>, vector<784x128xbf16>
    %cst = arith.constant dense<0.000000e+00> : vector<8x128xf32>
    %2 = tpu.matmul %0, %1, %cst {dimension_numbers = #tpu.dot_dimension_numbers<[1], [0], [0], [1], [0, 0, 1, 1], [], []>} : vector<8x784xbf16>, vector<784x128xbf16>, vector<8x128xf32> -> vector<8x128xf32>
    %c0_3 = arith.constant 0 : index
    %c0_4 = arith.constant 0 : index
    %3 = vector.load %arg3[%c0_3, %c0_4] : memref<1x128xf32, #tpu.memory_space<vmem>>, vector<1x128xf32>
    %4 = vector.broadcast %3 : vector<1x128xf32> to vector<8x128xf32>
    %5 = arith.addf %2, %4 : vector<8x128xf32>
    %6 = math.tanh %5 : vector<8x128xf32>
    %7 = arith.truncf %6 : vector<8x128xf32> to vector<8x128xbf16>
    %c0_5 = arith.constant 0 : index
    %c0_6 = arith.constant 0 : index
    %8 = vector.load %arg4[%c0_5, %c0_6] : memref<128x128xbf16, #tpu.memory_space<vmem>>, vector<128x128xbf16>
    %cst_7 = arith.constant dense<0.000000e+00> : vector<8x128xf32>
    %9 = tpu.matmul %7, %8, %cst_7 {dimension_numbers = #tpu.dot_dimension_numbers<[1], [0], [0], [1], [0, 0, 1, 1], [], []>} : vector<8x128xbf16>, vector<128x128xbf16>, vector<8x128xf32> -> vector<8x128xf32>
    %c0_8 = arith.constant 0 : index
    %c0_9 = arith.constant 0 : index
    %10 = vector.load %arg5[%c0_8, %c0_9] : memref<1x128xf32, #tpu.memory_space<vmem>>, vector<1x128xf32>
    %11 = vector.broadcast %10 : vector<1x128xf32> to vector<8x128xf32>
    %12 = arith.addf %9, %11 : vector<8x128xf32>
    %13 = math.tanh %12 : vector<8x128xf32>
    %14 = arith.truncf %13 : vector<8x128xf32> to vector<8x128xbf16>
    %c0_10 = arith.constant 0 : index
    %c0_11 = arith.constant 0 : index
    %15 = vector.load %arg6[%c0_10, %c0_11] : memref<128x128xbf16, #tpu.memory_space<vmem>>, vector<128x128xbf16>
    %cst_12 = arith.constant dense<0.000000e+00> : vector<8x128xf32>
    %16 = tpu.matmul %14, %15, %cst_12 {dimension_numbers = #tpu.dot_dimension_numbers<[1], [0], [0], [1], [0, 0, 1, 1], [], []>} : vector<8x128xbf16>, vector<128x128xbf16>, vector<8x128xf32> -> vector<8x128xf32>
    %c0_13 = arith.constant 0 : index
    %c0_14 = arith.constant 0 : index
    %17 = vector.load %arg7[%c0_13, %c0_14] : memref<1x128xf32, #tpu.memory_space<vmem>>, vector<1x128xf32>
    %18 = vector.broadcast %17 : vector<1x128xf32> to vector<8x128xf32>
    %19 = arith.addf %16, %18 : vector<8x128xf32>
    %20 = arith.truncf %19 : vector<8x128xf32> to vector<8x128xbf16>
    %c0_15 = arith.constant 0 : index
    %c0_16 = arith.constant 0 : index
    %21 = vector.load %arg8[%c0_15, %c0_16] : memref<8x128xbf16, #tpu.memory_space<vmem>>, vector<8x128xbf16>
    tpu.vector_store %arg8[%c0_15, %c0_16], %20 {strides = array<i32>} : memref<8x128xbf16, #tpu.memory_space<vmem>>, vector<8x128xbf16>,
    return
  }
  func.func @transform_0(%arg0: i32) -> (i32, i32) {
    %c0_i32 = arith.constant 0 : i32
    %c0_i32_0 = arith.constant 0 : i32
    return %arg0, %c0_i32 : i32, i32
  }
  func.func @transform_1(%arg0: i32) -> (i32, i32) {
    %c0_i32 = arith.constant 0 : i32
    %c0_i32_0 = arith.constant 0 : i32
    %c0_i32_1 = arith.constant 0 : i32
    return %c0_i32, %c0_i32_0 : i32, i32
  }
  func.func @transform_2(%arg0: i32) -> (i32, i32) {
    %c0_i32 = arith.constant 0 : i32
    %c0_i32_0 = arith.constant 0 : i32
    %c0_i32_1 = arith.constant 0 : i32
    return %c0_i32, %c0_i32_0 : i32, i32
  }
  func.func @transform_3(%arg0: i32) -> (i32, i32) {
    %c0_i32 = arith.constant 0 : i32
    %c0_i32_0 = arith.constant 0 : i32
    %c0_i32_1 = arith.constant 0 : i32
    return %c0_i32, %c0_i32_0 : i32, i32
  }
  func.func @transform_4(%arg0: i32) -> (i32, i32) {
    %c0_i32 = arith.constant 0 : i32
    %c0_i32_0 = arith.constant 0 : i32
    %c0_i32_1 = arith.constant 0 : i32
    return %c0_i32, %c0_i32_0 : i32, i32
  }
  func.func @transform_5(%arg0: i32) -> (i32, i32) {
    %c0_i32 = arith.constant 0 : i32
    %c0_i32_0 = arith.constant 0 : i32
    %c0_i32_1 = arith.constant 0 : i32
    return %c0_i32, %c0_i32_0 : i32, i32
  }
  func.func @transform_6(%arg0: i32) -> (i32, i32) {
    %c0_i32 = arith.constant 0 : i32
    %c0_i32_0 = arith.constant 0 : i32
    %c0_i32_1 = arith.constant 0 : i32
    return %c0_i32, %c0_i32_0 : i32, i32
  }
  func.func @transform_7(%arg0: i32) -> (i32, i32) {
    %c0_i32 = arith.constant 0 : i32
    %c0_i32_0 = arith.constant 0 : i32
    return %arg0, %c0_i32 : i32, i32
  }
}

</mosaic_0001>

<bundles_post_ra>
// kernel: tpu_custom_call.1
= control target key start
LH: loop header
LB: loop body
LE: loop exit
PB: predicated region body
PF: predicated region fallthrough
CT: control target
= control target key end

     0   :  { %12 = vsyncpa [#allocation3], 0  ;;  %s1423_s0 = inlined_call_operand.hbm [shape: bf16[8,784], index: 0, kind: input, shape index: {}]   ;;  %s1424_s1 = inlined_call_operand.hbm [shape: bf16[784,128], index: 1, kind: input, shape index: {}]   ;;  %s1425_s2 = inlined_call_operand.vmem [shape: f32[1,128], index: 2, kind: input, shape index: {}]   ;;  %s1426_s3 = inlined_call_operand.hbm [shape: bf16[128,128], index: 3, kind: input, shape index: {}]   ;;  %s1427_s4 = inlined_call_operand.vmem [shape: f32[1,128], index: 4, kind: input, shape index: {}]   ;;  %s1428_s5 = inlined_call_operand.hbm [shape: bf16[128,128], index: 5, kind: input, shape index: {}]   ;;  %s1429_s6 = inlined_call_operand.vmem [shape: f32[1,128], index: 6, kind: input, shape index: {}]   ;;  %s1430_s7 = inlined_call_operand.hbm [shape: bf16[8,128], index: 7, kind: output, shape index: {}]  }
   0x1   :  { %13 = vsyncpa [#allocation6], 0 }
   0x2   :  { %14 = vsyncpa [#allocation9], 0 }
   0x3   :  { %15 = vsyncpa [#allocation4], 0  ;;  %s1318_s24 = smov [#allocation5]  }
   0x4   :  { %s31_s25 = sshll.u32 %s1318_s24, 4  ;;  %s32_s25 = int_to_ptr.vmem [resolvable:$true] %s31_s25 }
   0x5   :  { %s1218_s26 = scalar_lea.vmem %s32_s25, 6272  ;;  %p1223_p1 = scmp.lt.s32.totalorder %s32_s25, %s32_s25 }
   0x6   :  { %p1219_p0 = scmp.ne.s32.totalorder %s32_s25, %s1218_s26  ;;  %p1224_p2 = scmp.lt.s32.totalorder %s1218_s26, %s1218_s26 }
   0x8   :  { %p1225_p3 = por %p1224_p2, %p1223_p1 }
   0xa   :  { %p1226_p4 = pnand %p1225_p3, %p1219_p0 }
   0xc   :  { %1229 = shalt.err (!%p1226_p4)
}
   0xd   :  { %s1319_s27 = smov 64   ;;  %s1320_s28 = smov 4  }
   0xe   :  { %37 = dma.hbm_to_vmem [thread:$0]  %s1424_s1, 6272, %s32_s25, [#allocation6], %s1319_s27, %s1319_s27, %s1320_s28  }
   0xf   :  { %s1321_s8 = smov [#allocation2]   ;;  %s1322_s10 = smov [#allocation7]  }
  0x10   :  { %s22_s9 = sshll.u32 %s1321_s8, 4  ;;  %s45_s11 = sshll.u32 %s1322_s10, 4  ;;  %s23_s9 = int_to_ptr.vmem [resolvable:$true] %s22_s9  ;;  %s46_s11 = int_to_ptr.vmem [resolvable:$true] %s45_s11 }
  0x11   :  { %s1238_s12 = scalar_lea.vmem %s23_s9, 448  ;;  %p1243_p6 = scmp.lt.s32.totalorder %s23_s9, %s23_s9 }
  0x12   :  { %p1239_p5 = scmp.ne.s32.totalorder %s23_s9, %s1238_s12  ;;  %p1244_p7 = scmp.lt.s32.totalorder %s1238_s12, %s1238_s12 }
  0x14   :  { %p1245_p8 = por %p1244_p7, %p1243_p6 }
  0x16   :  { %p1246_p9 = pnand %p1245_p8, %p1239_p5 }
  0x18   :  { %1249 = shalt.err (!%p1246_p9)
}
  0x19   :  { %25 = dma.hbm_to_vmem [thread:$0]  %s1423_s0, 448, %s23_s9, [#allocation3]  }
  0x1a   :  { %s1258_s15 = scalar_lea.vmem %s46_s11, 1024  ;;  %p1263_p11 = scmp.lt.s32.totalorder %s46_s11, %s46_s11 }
  0x1b   :  { %p1259_p10 = scmp.ne.s32.totalorder %s46_s11, %s1258_s15  ;;  %p1264_p12 = scmp.lt.s32.totalorder %s1258_s15, %s1258_s15 }
  0x1d   :  { %p1265_p13 = por %p1264_p12, %p1263_p11 }
  0x1f   :  { %p1266_p0 = pnand %p1265_p13, %p1259_p10 }
  0x21   :  { %1269 = shalt.err (!%p1266_p0)
}
  0x22   :  { %51 = dma.hbm_to_vmem [thread:$0]  %s1426_s3, 1024, %s46_s11, [#allocation6], %s1319_s27, %s1319_s27, %s1320_s28  }
  0x23   :  { %s1323_s17 = smov [#allocation8]  }
  0x24   :  { %s59_s18 = sshll.u32 %s1323_s17, 4  ;;  %s60_s18 = int_to_ptr.vmem [resolvable:$true] %s59_s18 }
  0x25   :  { %s1278_s19 = scalar_lea.vmem %s60_s18, 1024  ;;  %p1283_p2 = scmp.lt.s32.totalorder %s60_s18, %s60_s18 }
  0x26   :  { %p1279_p1 = scmp.ne.s32.totalorder %s60_s18, %s1278_s19  ;;  %p1284_p3 = scmp.lt.s32.totalorder %s1278_s19, %s1278_s19 }
  0x28   :  { %p1285_p4 = por %p1284_p3, %p1283_p2 }
  0x2a   :  { %p1286_p5 = pnand %p1285_p4, %p1279_p1 }
  0x2c   :  { %1289 = shalt.err (!%p1286_p5)
}
  0x2d   :  { %65 = dma.hbm_to_vmem [thread:$0]  %s1428_s5, 1024, %s60_s18, [#allocation9], %s1319_s27, %s1319_s27, %s1320_s28  }
  0x2e   :  { %1310 = dma.done.wait [#allocation3], 448  }
  0x2f   :  { %1311 = vsyncadd [#allocation3], 4294966848 }
  0x30   :  { %1312 = dma.done.wait [#allocation6], 7296  }
  0x31   :  { %1313 = vsyncadd [#allocation6], 4294960000 }
  0x32   :  { %1314 = dma.done.wait [#allocation9], 1024  }
  0x33   :  { %1315 = vsyncadd [#allocation9], 4294966272  ;;  %v1134_v0 = vld [vmem:[#allocation5 + $0x78] sm:$0xff]   ;;  %v1138_v4 = vld [vmem:[#allocation5 + $0x70] sm:$0xff]   ;;  %v1324_v43 = vmov 0.0   ;;  %vm1325_vm0 = vmmov 0  }
  0x34   :  { %v1135_v1 = vld [vmem:[#allocation5 + $0x38] sm:$0xff]   ;;  %993 = vmatprep.subr.bf16.mxu0 %v1134_v0  ;;  %v1139_v5 = vld [vmem:[#allocation5 + $0x30] sm:$0xff]   ;;  %v1142_v8 = vld [vmem:[#allocation5 + $0x68] sm:$0xff]   ;;  %vm508_vm1 = vcmask 130048   ;;  %s1326_s24 = smov [#allocation10]  }
  0x35   :  { %v1136_v2 = vld [vmem:[#allocation5 + $0xf8] sm:$0xff]   ;;  %994 = vmatpush3.bf16.msra.mxu0 %v1135_v1  ;;  %v1140_v6 = vld [vmem:[#allocation5 + $0xf0] sm:$0xff]   ;;  %v1143_v9 = vld [vmem:[#allocation5 + $0x28] sm:$0xff]   ;;  %s906_s25 = sshll.u32 %s1326_s24, 4  ;;  %s907_s25 = int_to_ptr.vmem [resolvable:$true] %s906_s25 }
  0x36   :  { %v1137_v3 = vld [vmem:[#allocation5 + $0xb8] sm:$0xff]   ;;  %1015 = vmatprep.subr.bf16.mxu1 %v1136_v2  ;;  %995 = vmatprep.subr.bf16.mxu0 %v1138_v4  ;;  %v1141_v7 = vld [vmem:[#allocation5 + $0xb0] sm:$0xff]   ;;  %v1144_v10 = vld [vmem:[#allocation5 + $0xe8] sm:$0xff]   ;;  %p1295_p7 = scmp.lt.s32.totalorder %s907_s25, %s907_s25 }
  0x37   :  { %1016 = vmatpush3.bf16.msra.mxu1 %v1137_v3  ;;  %v1145_v11 = vld [vmem:[#allocation5 + $0xa8] sm:$0xff]   ;;  %v1146_v12 = vld [vmem:[#allocation5 + $0x60] sm:$0xff]   ;;  %v1150_v16 = vld [vmem:[#allocation5 + $0x58] sm:$0xff]  }
  0x38   :  { %1017 = vmatprep.subr.bf16.mxu1 %v1140_v6  ;;  %v1147_v13 = vld [vmem:[#allocation5 + $0x20] sm:$0xff]   ;;  %v1151_v17 = vld [vmem:[#allocation5 + $0x18] sm:$0xff]   ;;  %v1154_v20 = vld [vmem:[#allocation5 + $0x50] sm:$0xff]  }
  0x39   :  { %996 = vmatpush3.bf16.msra.mxu0 %v1139_v5  ;;  %v1148_v14 = vld [vmem:[#allocation5 + $0xe0] sm:$0xff]   ;;  %v1152_v18 = vld [vmem:[#allocation5 + $0xd8] sm:$0xff]   ;;  %v1155_v21 = vld [vmem:[#allocation5 + $0x10] sm:$0xff]  }
  0x3a   :  { %997 = vmatprep.subr.bf16.mxu0 %v1142_v8  ;;  %v1149_v15 = vld [vmem:[#allocation5 + $0xa0] sm:$0xff]   ;;  %v1153_v19 = vld [vmem:[#allocation5 + $0x98] sm:$0xff]   ;;  %v1156_v22 = vld [vmem:[#allocation5 + $0xd0] sm:$0xff]  }
  0x3b   :  { %1018 = vmatpush3.bf16.msra.mxu1 %v1141_v7  ;;  %v1157_v23 = vld [vmem:[#allocation5 + $0x90] sm:$0xff]   ;;  %v1158_v24 = vld [vmem:[#allocation5 + $0x48] sm:$0xff]   ;;  %v1162_v28 = vld [vmem:[#allocation5 + $0x40] sm:$0xff]  }
  0x3c   :  { %1019 = vmatprep.subr.bf16.mxu1 %v1144_v10  ;;  %v1159_v25 = vld [vmem:[#allocation5 + $0x8] sm:$0xff]   ;;  %v1163_v29 = vld [vmem:[#allocation5] sm:$0xff]   ;;  %v1168_v35 = vld [vmem:[#allocation5 + $0x178] sm:$0xff]  }
  0x3d   :  { %998 = vmatpush3.bf16.msra.mxu0 %v1143_v9  ;;  %v1160_v26 = vld [vmem:[#allocation5 + $0xc8] sm:$0xff]   ;;  %v1164_v30 = vld [vmem:[#allocation5 + $0xc0] sm:$0xff]   ;;  %v1171_v39 = vld [vmem:[#allocation5 + $0x138] sm:$0xff]  }
  0x3e   :  { %999 = vmatprep.subr.bf16.mxu0 %v1146_v12  ;;  %v1161_v27 = vld [vmem:[#allocation5 + $0x88] sm:$0xff]   ;;  %v1167_v34 = vld [vmem:[#allocation5 + $0x80] sm:$0xff]   ;;  %v1172_v40 = vld [vmem:[#allocation5 + $0x170] sm:$0xff]  }
  0x3f   :  { %1020 = vmatpush3.bf16.msra.mxu1 %v1145_v11  ;;  %v81_v31 = vld [vmem:[#allocation2] sm:$0xff]  ;;  %v82_v36 = vld [vmem:[#allocation2 + $0x8] sm:$0xff]  ;;  %v1178_v47 = vld [vmem:[#allocation5 + $0x158] sm:$0xff]  }
  0x40   :  { %1021 = vmatprep.subr.bf16.mxu1 %v1148_v14  ;;  %v918_v32 = vcombine.low %v81_v31, %v81_v31  ;;  %v919_v33 = vcombine.high %v81_v31, %v81_v31  ;;  %v920_v37 = vcombine.low %v82_v36, %v82_v36  ;;  %v921_v38 = vcombine.high %v82_v36, %v82_v36  ;;  %v1173_v41 = vld [vmem:[#allocation5 + $0x130] sm:$0xff]   ;;  %v1174_v42 = vld [vmem:[#allocation5 + $0x168] sm:$0xff]   ;;  %v1176_v45 = vld [vmem:[#allocation5 + $0x160] sm:$0xff]  }
  0x41   :  { %1000 = vmatpush3.bf16.msra.mxu0 %v1147_v13  ;;  %v1175_v44 = vld [vmem:[#allocation5 + $0x128] sm:$0xff]   ;;  %v1177_v46 = vld [vmem:[#allocation5 + $0x120] sm:$0xff]   ;;  %v1179_v48 = vld [vmem:[#allocation5 + $0x118] sm:$0xff]  }
  0x42   :  { %1001 = vmatprep.subr.bf16.mxu0 %v1150_v16  ;;  %544 = vmatprep.mubr.bf16.mxu0 %v919_v33  ;;  %v1180_v49 = vld [vmem:[#allocation5 + $0x150] sm:$0xff]   ;;  %v1186_v50 = vld [vmem:[#allocation5 + $0x180] sm:$0xff]   ;;  %v1189_v54 = vld [vmem:[#allocation2 + $0x18] ss:$0 sps:$4 sm:$0xff]  }
  0x43   :  { %1022 = vmatpush3.bf16.msra.mxu1 %v1149_v15  ;;  %584 = vmatprep.mubr.bf16.mxu1 %v921_v38  ;;  %v83_v51 = vld [vmem:[#allocation2 + $0x10] sm:$0xff]  ;;  %v1182_v55 = vld [vmem:[#allocation5 + $0x148] sm:$0xff]   ;;  %v1184_v57 = vld [vmem:[#allocation5 + $0x140] sm:$0xff]  }
  0x44   :  { %1023 = vmatprep.subr.bf16.mxu1 %v1152_v18  ;;  %v1181_v52 = vld [vmem:[#allocation5 + $0x110] sm:$0xff]   ;;  %v923_v53 = vcombine.high %v83_v51, %v83_v51  ;;  %v1183_v56 = vld [vmem:[#allocation5 + $0x108] sm:$0xff]   ;;  %v1185_v58 = vld [vmem:[#allocation5 + $0x100] sm:$0xff]   ;;  %v922_v59 = vcombine.low %v83_v51, %v83_v51 }
  0x45   :  { %1002 = vmatpush3.bf16.msra.mxu0 %v1151_v17  ;;  %v1190_v60 = vld [vmem:[#allocation7 + $0x38] sm:$0xff]   ;;  %v1191_v61 = vld [vmem:[#allocation7 + $0x30] sm:$0xff]   ;;  %v1192_v62 = vld [vmem:[#allocation7 + $0x28] sm:$0xff]  }
  0x46   :  { %1003 = vmatprep.subr.bf16.mxu0 %v1154_v20  ;;  %v1193_v63 = vld [vmem:[#allocation7 + $0x20] sm:$0xff]   ;;  %v1194_v0 = vld [vmem:[#allocation7 + $0x18] sm:$0xff]   ;;  %v1195_v1 = vld [vmem:[#allocation7 + $0x10] sm:$0xff]  }
  0x47   :  { %1024 = vmatpush3.bf16.msra.mxu1 %v1153_v19  ;;  %v1196_v2 = vld [vmem:[#allocation7 + $0x8] sm:$0xff]   ;;  %v1197_v3 = vld [vmem:[#allocation7] sm:$0xff]   ;;  %v1198_v4 = vld [vmem:[#allocation8 + $0x38] sm:$0xff]  }
  0x48   :  { %1025 = vmatprep.subr.bf16.mxu1 %v1156_v22  ;;  %v1199_v5 = vld [vmem:[#allocation8 + $0x30] sm:$0xff]   ;;  %v1200_v6 = vld [vmem:[#allocation8 + $0x28] sm:$0xff]   ;;  %v917_v20 = vld [vmem:[%s1425_s2] ss:$0 sm:$0xff] }
  0x49   :  { %1004 = vmatpush3.bf16.msra.mxu0 %v1155_v21  ;;  %v1201_v33 = vld [vmem:[#allocation8 + $0x20] sm:$0xff]   ;;  %v1204_v36 = vld [vmem:[#allocation8 + $0x8] sm:$0xff]   ;;  %v975_v38 = vld [vmem:[%s1427_s4] ss:$0 sm:$0xff]  ;;  %s1290_s4 = scalar_lea.vmem %s907_s25, 64 }
  0x4a   :  { %1005 = vmatprep.subr.bf16.mxu0 %v1158_v24  ;;  %p1291_p6 = scmp.ne.s32.totalorder %s907_s25, %s1290_s4  ;;  %p1296_p8 = scmp.lt.s32.totalorder %s1290_s4, %s1290_s4 }
  0x4b   :  { %1026 = vmatpush3.bf16.msra.mxu1 %v1157_v23 }
  0x4c   :  { %1027 = vmatprep.subr.bf16.mxu1 %v1160_v26  ;;  %p1297_p9 = por %p1296_p8, %p1295_p7 }
  0x4d   :  { %1006 = vmatpush3.bf16.msra.mxu0 %v1159_v25 }
  0x4e   :  { %1007 = vmatprep.subr.bf16.mxu0 %v1162_v28  ;;  %p1298_p10 = pnand %p1297_p9, %p1291_p6 }
  0x4f   :  { %1028 = vmatpush3.bf16.msra.mxu1 %v1161_v27 }
  0x50   :  { %1029 = vmatprep.subr.bf16.mxu1 %v1164_v30 }
  0x51   :  { %1008 = vmatpush3.bf16.msra.mxu0 %v1163_v29 }
  0x52   :  { %1037 = vmatprep.subr.bf16.mxu0 %v1168_v35  ;;  %v1203_v35 = vld [vmem:[#allocation8 + $0x10] sm:$0xff]  }
  0x53   :  { %1030 = vmatpush3.bf16.msra.mxu1 %v1167_v34  ;;  %v1202_v34 = vld [vmem:[#allocation8 + $0x18] sm:$0xff]  }
  0x54   :  { %545 = vmatmul.mubr.bf16.vlgmr.msra.gmra.mxu0 %v918_v32  ;;  %1079 = vmatprep.subr.bf16.mxu1 %v1324_v43 }
  0x55   :  { %1038 = vmatpush3.bf16.msra.mxu0 %v1171_v39  ;;  %624 = vmatprep.mubr.bf16.mxu0 %v923_v53 }
  0x56   :  { %585 = vmatmul.mubr.bf16.vlgmr.msra.gmra.mxu1 %v920_v37  ;;  %1039 = vmatprep.subr.bf16.mxu0 %v1172_v40  ;;  %v1205_v37 = vld [vmem:[#allocation8] sm:$0xff]  }
  0x57   :  { %1081 = vmatprep.mubr.msk.bf16.mxu1 %vm1325_vm0, %v1324_v43  ;;  %1080 = vmatpush3.bf16.msra.mxu1 %v1186_v50 }
  0x58   :  { %1085 = vmatprep.subr.bf16.mxu1 %v1324_v43 }
  0x59   :  { %1040 = vmatpush3.bf16.msra.mxu0 %v1173_v41 }
  0x5a   :  { %1041 = vmatprep.subr.bf16.mxu0 %v1174_v42 }
  0x5d   :  { %1042 = vmatpush3.bf16.msra.mxu0 %v1175_v44 }
  0x5e   :  { %1043 = vmatprep.subr.bf16.mxu0 %v1176_v45  ;;  %1082 = vmatmul.mubr.msk.bf16.vlgmr.msra.gmra.mxu1 %vm508_vm1, %v1189_v54 }
  0x5f   :  { %1101 = vmatprep.mubr.msk.bf16.mxu1 %vm1325_vm0, %v1324_v43  ;;  %1086 = vmatpush3.bf16.msra.mxu1 %v1190_v60 }
  0x60   :  { %1087 = vmatprep.subr.bf16.mxu1 %v1324_v43 }
  0x61   :  { %1044 = vmatpush3.bf16.msra.mxu0 %v1177_v46 }
  0x62   :  { %1045 = vmatprep.subr.bf16.mxu0 %v1178_v47  ;;  %v984_v47 = vld [vmem:[%s1429_s6] ss:$0 sm:$0xff] }
  0x63   :  { %1088 = vmatpush3.bf16.msra.mxu1 %v1191_v61 }
  0x64   :  { %1089 = vmatprep.subr.bf16.mxu1 %v1324_v43 }
  0x65   :  { %1046 = vmatpush3.bf16.msra.mxu0 %v1179_v48 }
  0x66   :  { %1047 = vmatprep.subr.bf16.mxu0 %v1180_v49 }
  0x67   :  { %1090 = vmatpush3.bf16.msra.mxu1 %v1192_v62 }
  0x68   :  { %1091 = vmatprep.subr.bf16.mxu1 %v1324_v43 }
  0x69   :  { %1048 = vmatpush3.bf16.msra.mxu0 %v1181_v52 }
  0x6a   :  { %1049 = vmatprep.subr.bf16.mxu0 %v1182_v55 }
  0x6b   :  { %1092 = vmatpush3.bf16.msra.mxu1 %v1193_v63 }
  0x6c   :  { %1093 = vmatprep.subr.bf16.mxu1 %v1324_v43 }
  0x6d   :  { %1050 = vmatpush3.bf16.msra.mxu0 %v1183_v56 }
  0x6e   :  { %1051 = vmatprep.subr.bf16.mxu0 %v1184_v57 }
  0x6f   :  { %1094 = vmatpush3.bf16.msra.mxu1 %v1194_v0 }
  0x70   :  { %1095 = vmatprep.subr.bf16.mxu1 %v1324_v43 }
  0x71   :  { %1052 = vmatpush3.bf16.msra.mxu0 %v1185_v58 }
  0x72   :  { %1105 = vmatprep.subr.bf16.mxu0 %v1324_v43 }
  0x73   :  { %1096 = vmatpush3.bf16.msra.mxu1 %v1195_v1 }
  0x74   :  { %625 = vmatmul.mubr.bf16.vlgmr.msra.gmra.mxu0 %v922_v59  ;;  %1097 = vmatprep.subr.bf16.mxu1 %v1324_v43 }
  0x75   :  { %1121 = vmatprep.mubr.msk.bf16.mxu0 %vm1325_vm0, %v1324_v43  ;;  %1106 = vmatpush3.bf16.msra.mxu0 %v1198_v4 }
  0x76   :  { %1107 = vmatprep.subr.bf16.mxu0 %v1324_v43 }
  0x77   :  { %1098 = vmatpush3.bf16.msra.mxu1 %v1196_v2 }
  0x78   :  { %1099 = vmatprep.subr.bf16.mxu1 %v1324_v43 }
  0x79   :  { %1108 = vmatpush3.bf16.msra.mxu0 %v1199_v5 }
  0x7a   :  { %1109 = vmatprep.subr.bf16.mxu0 %v1324_v43 }
  0x7b   :  { %1100 = vmatpush3.bf16.msra.mxu1 %v1197_v3 }
  0x7d   :  { %1110 = vmatpush3.bf16.msra.mxu0 %v1200_v6 }
  0x7e   :  { %1111 = vmatprep.subr.bf16.mxu0 %v1324_v43 }
  0x81   :  { %1112 = vmatpush3.bf16.msra.mxu0 %v1201_v33 }
  0x82   :  { %1113 = vmatprep.subr.bf16.mxu0 %v1324_v43 }
  0x85   :  { %1114 = vmatpush3.bf16.msra.mxu0 %v1202_v34 }
  0x86   :  { %1115 = vmatprep.subr.bf16.mxu0 %v1324_v43 }
  0x89   :  { %1116 = vmatpush3.bf16.msra.mxu0 %v1203_v35 }
  0x8a   :  { %1117 = vmatprep.subr.bf16.mxu0 %v1324_v43 }
  0x8d   :  { %1118 = vmatpush3.bf16.msra.mxu0 %v1204_v36 }
  0x8e   :  { %1119 = vmatprep.subr.bf16.mxu0 %v1324_v43 }
  0x91   :  { %1120 = vmatpush3.bf16.msra.mxu0 %v1205_v37 }
 0x114   :  { %v1009_v7 = vpop.f32.mrf.mxu0 }
 0x116   :  { %v1010_v8 = vpop.f32.mrf.mxu0  ;;  %v1031_v9 = vpop.f32.mrf.mxu1 }
 0x117   :  { %v1011_v19 = vadd.f32 %v1010_v8, %v1009_v7 }
 0x118   :  { %v1012_v10 = vpop.f32.mrf.mxu0  ;;  %v1032_v11 = vpop.f32.mrf.mxu1 }
 0x119   :  { %v547_v21 = vadd.f32 %v1011_v19, %v917_v20  ;;  %v1033_v22 = vadd.f32 %v1032_v11, %v1031_v9 }
 0x11a   :  { %v1013_v12 = vpop.f32.mrf.mxu0  ;;  %v1034_v13 = vpop.f32.mrf.mxu1 }
 0x11b   :  { %v587_v25 = vadd.f32 %v1033_v22, %v547_v21 }
 0x11c   :  { %v1035_v14 = vpop.f32.mrf.mxu1 }
 0x11e   :  { %v666_v15 = vpop.f32.mrf.mxu1 }
 0x120   :  { %v1083_v16 = vpop.f32.mrf.mxu1 }
 0x122   :  { %v669_v17 = vpop.f32.mrf.mxu1 }
 0x124   :  { %v1084_v18 = vpop.f32.mrf.mxu1 }
 0x134   :  { %v1053_v23 = vpop.f32.mrf.mxu0 }
 0x136   :  { %v1054_v24 = vpop.f32.mrf.mxu0 }
 0x137   :  { %v1055_v26 = vadd.f32 %v1054_v24, %v1053_v23 }
 0x138   :  { %v1056_v27 = vpop.f32.mrf.mxu0 }
 0x139   :  { %v627_v28 = vadd.f32 %v1055_v26, %v587_v25 }
 0x13a   :  { %v1057_v29 = vpop.f32.mrf.mxu0 }
 0x13b   :  { %v667_v30 = vadd.f32 %v666_v15, %v627_v28 }
 0x13d   :  { %1206 = vtanh.f32 %v667_v30 }
 0x14a   :  { %v1207_v31 = vpop.eup %1206 }
 0x14b   :  { %v673_v32 = vpack.c.bf16 %v1207_v31, %v1207_v31 }
 0x14d   :  { %1102 = vmatmul.mubr.bf16.vlgmr.msra.gmra.mxu1 %v673_v32 }
 0x20d   :  { %v779_v39 = vpop.f32.mrf.mxu1 }
 0x20e   :  { %v780_v40 = vadd.f32 %v975_v38, %v779_v39 }
 0x20f   :  { %v1103_v41 = vpop.f32.mrf.mxu1 }
 0x210   :  { %1208 = vtanh.f32 %v780_v40 }
 0x211   :  { %v782_v42 = vpop.f32.mrf.mxu1 }
 0x213   :  { %v1104_v44 = vpop.f32.mrf.mxu1 }
 0x21d   :  { %v1209_v45 = vpop.eup %1208 }
 0x21e   :  { %v786_v46 = vpack.c.bf16 %v1209_v45, %v1209_v45 }
 0x220   :  { %1122 = vmatmul.mubr.bf16.vlgmr.msra.gmra.mxu0 %v786_v46 }
 0x2e0   :  { %v892_v43 = vpop.f32.mrf.mxu0 }
 0x2e1   :  { %v893_v48 = vadd.f32 %v984_v47, %v892_v43 }
 0x2e2   :  { %v1123_v49 = vpop.f32.mrf.mxu0 }
 0x2e3   :  { %v898_v50 = vpack.c.bf16 %v893_v48, %v893_v48 }
 0x2e4   :  { %v895_v51 = vpop.f32.mrf.mxu0 }
 0x2e5   :  { %899 = vst [vmem:[#allocation10] sm:$0xf] %v898_v50 }
 0x2e6   :  { %v1124_v52 = vpop.f32.mrf.mxu0 }
 0x2e7   :  { %1301 = shalt.err (!%p1298_p10)
}
 0x2e8   :  { %909 = dma.vmem_to_hbm [thread:$0]  %s907_s25, 64, %s1430_s7, [#allocation4]  }
 0x2e9   :  { %1316 = dma.done.wait [#allocation4], 64  }
 0x2ea   :  { %1317 = vsyncadd [#allocation4], 4294967232 }
 0x2eb   :  { %913 = vsyncpa [#allocation3], 1 }
 0x2ec   :  { %914 = vsyncpa [#allocation6], 1 }
 0x2ed   :  { %915 = vsyncpa [#allocation9], 1 }
 0x2ee   :  { %916 = vsyncpa [#allocation4], 1 }

</bundles_post_ra>
